<compile_context>
chip_gen: v7x
topology: tpu7x:2x2x1
jax: 0.10.0
libtpu: 0.0.40
codegen_flags: <defaults>
</compile_context>

<pallas_src>
import functools

import jax
import jax.numpy as jnp
from jax.experimental import pallas as pl
from jax.experimental.pallas import tpu as pltpu

_MASK = -1e30   # finite "minus infinity" for padded vocab columns (avoids inf-inf NaN)
_LANE = 128


def _round_up(x, m):
    return (x + m - 1) // m * m


# --------------------------------------------------------------------------- kernel
def _flce_kernel(tgt_ref, x_ref, w_ref, b_ref, loss_ref,
                 m_ref, l_ref, xy_ref, *maybe_sx,
                 tv, vocab_size, v_padded, ignore_index, lse_square_scale,
                 label_smoothing, softcap, inv_softcap):
    vi = pl.program_id(1)
    use_smoothing = label_smoothing > 0.0
    sx_ref = maybe_sx[0] if use_smoothing else None

    @pl.when(vi == 0)
    def _():
        m_ref[...] = jnp.full_like(m_ref, -jnp.inf)
        l_ref[...] = jnp.zeros_like(l_ref)
        xy_ref[...] = jnp.zeros_like(xy_ref)
        if use_smoothing:
            sx_ref[...] = jnp.zeros_like(sx_ref)

    # Hot path: MXU matmul for this (token-tile, vocab-tile) block of logits.
    # Both contracting dims = 1 -> A[tb,H] . B[tv,H]^T without materializing a
    # transposed weight tile (verified to lower to a direct MXU matmul).
    logits = jax.lax.dot_general(
        x_ref[...], w_ref[...],
        dimension_numbers=(((1,), (1,)), ((), ())),
        preferred_element_type=jnp.float32)                       # (tb, tv) f32
    logits = logits + b_ref[...].astype(jnp.float32)              # bias (1, tv)

    if softcap is not None:
        logits = softcap * jnp.tanh(logits * inv_softcap)

    # Loop-invariant local column iota; reused for masking and the target gather.
    col = jax.lax.broadcasted_iota(jnp.int32, logits.shape, 1)

    if v_padded:
        # Mask padded vocab columns AFTER softcap so they never contribute.
        valid_col = col < (vocab_size - vi * tv)
        logits = jnp.where(valid_col, logits, _MASK)

    # Online logsumexp over the vocab axis (f32 state); exp computed once.
    m_prev = m_ref[...]
    m_new = jnp.maximum(m_prev, logits.max(axis=-1, keepdims=True))
    p = jnp.exp(logits - m_new)
    alpha = jnp.exp(m_prev - m_new)
    l_ref[...] = alpha * l_ref[...] + p.sum(axis=-1, keepdims=True)
    m_ref[...] = m_new

    # Running sum of logits (only when label smoothing is enabled).
    if use_smoothing:
        s = jnp.where(valid_col, logits, 0.0) if v_padded else logits
        sx_ref[...] += s.sum(axis=-1, keepdims=True)

    # Gather the target-class logit: shift targets into local tile coordinates
    # (one scalar subtract) and compare against the loop-invariant iota.
    tgt_local = tgt_ref[...] - vi * tv                             # (tb, 1) int32
    xy_ref[...] += jnp.sum(jnp.where(col == tgt_local, logits, 0.0),
                           axis=-1, keepdims=True)

    @pl.when(vi == pl.num_programs(1) - 1)
    def _():
        lse = m_ref[...] + jnp.log(l_ref[...])
        loss = lse - xy_ref[...]
        if use_smoothing:
            eps = label_smoothing
            # loss = lse - (1-eps)*x_y - (eps/V)*sum_j x_j
            loss = (1.0 - eps) * loss + eps * lse - (eps / vocab_size) * sx_ref[...]
        if lse_square_scale != 0.0:
            loss = loss + lse_square_scale * lse * lse
        valid = tgt_ref[...] != ignore_index
        loss_ref[...] = jnp.where(valid, loss, 0.0)


# ------------------------------------------------------------------- tile selection
def _device_info():
    """Best-effort (vmem_capacity_bytes, generation, tensorcores_per_device)."""
    vmem_cap = None
    try:
        vmem_cap = int(pltpu.get_tpu_info().vmem_capacity_bytes)
    except Exception:
        vmem_cap = None
    kind = ""
    try:
        kind = str(jax.devices()[0].device_kind).lower()
    except Exception:
        pass
    if "v5 lite" in kind or "v5e" in kind or "v5lite" in kind:
        gen = "v5e"
    elif "v6" in kind:
        gen = "v6e"
    elif "7" in kind:
        gen = "v7x"
    elif "v5p" in kind or "v5" in kind:
        gen = "v5p"
    elif "v4" in kind:
        gen = "v4"
    else:
        gen = "unknown"
    num_tc = 2 if gen in ("v7x", "v5p", "v4") else 1
    if vmem_cap is None:
        vmem_cap = (64 << 20) if gen in ("v7x", "unknown") else (128 << 20)
    return vmem_cap, gen, num_tc


def _estimate_vmem(tb, tv, H, x_isz, w_isz, b_isz, n_scratch):
    """VMEM footprint estimate, accounting for (8,128) lane/sublane padding."""
    Hr = _round_up(H, _LANE)
    x_tile = 1 * tb * Hr * x_isz                     # _input tile, single-buffered
    w_tile = 2 * tv * Hr * w_isz                     # weight tile, double-buffered
    b_tile = 2 * 8 * _round_up(tv, _LANE) * b_isz    # (1,tv) pads sublanes to 8
    t_tile = 2 * tb * _LANE * 4                      # (tb,1) int32 pads lanes to 128
    o_tile = 2 * tb * _LANE * 4                      # (tb,1) f32 output
    scr = n_scratch * tb * _LANE * 4                 # (tb,1) f32 accumulators
    tmp = 4 * tb * tv * 4                            # f32 logits/exp/iota/select temps
    return x_tile + w_tile + b_tile + t_tile + o_tile + scr + tmp


def _select_tiles(BT, V, H, x_isz, w_isz, b_isz, n_scratch, vmem_cap, gen, num_tc):
    """Roofline- and VMEM-aware (tb, tv) selection per TPU generation."""
    budget = int(0.75 * vmem_cap) - (2 << 20)        # headroom for mosaic scratch
    if gen == "v5e":
        # v5e only needs tb >= ~256 (bf16) for compute-boundness; spend VMEM on tv.
        tb_pref = (512, 384, 256, 128, 64, 32, 16, 8)
        tv_pref = (1024, 512, 256, 128)
    elif gen == "v7x":
        # 64 MiB VMEM/TC: keep tb large for the roofline, cap tv at 512.
        tb_pref = (1024, 768, 512, 384, 256, 128, 64, 32, 16, 8)
        tv_pref = (512, 256, 128)
    else:  # v6e / v5p / v4 / unknown
        tb_pref = (1024, 768, 512, 256, 128, 64, 32, 16, 8)
        tv_pref = (1024, 512, 256, 128)

    BT8 = _round_up(max(BT, 1), 8)
    tb_cap = BT8
    if num_tc >= 2 and BT8 >= 16:
        # Ensure >=2 token blocks so the "parallel" axis shards across both cores.
        tb_cap = max(8, _round_up(BT8 // 2, 8))
    tb_cands = sorted({c for c in tb_pref if c <= tb_cap} | {tb_cap}, reverse=True)

    tv_cap = _round_up(max(V, 1), _LANE)
    tv_cands = sorted({c for c in tv_pref if c <= tv_cap} | {tv_cap}, reverse=True)

    for tb in tb_cands:
        for tv in tv_cands:
            if _estimate_vmem(tb, tv, H, x_isz, w_isz, b_isz, n_scratch) <= budget:
                return tb, tv
    return tb_cands[-1], tv_cands[-1]


# -------------------------------------------------------------------------- wrapper
def fused_linear_cross_entropy(lin_weight, _input, target, bias=None, *,
                               ignore_index=-100, lse_square_scale=0.0,
                               label_smoothing=0.0, reduction="mean",
                               softcap=None, tb=None, tv=None):
    """JAX/Pallas equivalent of LigerFusedLinearCrossEntropyLoss.forward."""
    BT, H = _input.shape
    V, H2 = lin_weight.shape
    assert H == H2
    assert reduction in ("mean", "sum", "none")

    x_isz = jnp.dtype(_input.dtype).itemsize
    w_isz = jnp.dtype(lin_weight.dtype).itemsize
    b_dtype = _input.dtype if bias is None else bias.dtype
    b_isz = jnp.dtype(b_dtype).itemsize
    n_scratch = 4 if label_smoothing > 0.0 else 3

    # --- generation-aware, VMEM-feedback tile selection ---------------------
    vmem_cap, gen, num_tc = _device_info()
    tb_sel, tv_sel = _select_tiles(BT, V, H, x_isz, w_isz, b_isz, n_scratch,
                                   vmem_cap, gen, num_tc)
    if tb is None:
        tb = tb_sel
    if tv is None:
        tv = tv_sel
    assert tb % 8 == 0 and tv % _LANE == 0

    BT_pad = _round_up(BT, tb)
    V_pad = _round_up(V, tv)
    v_padded = V_pad != V

    # --- pad + mask instead of falling back to tv=V / tb=BT ----------------
    x = _input
    w = lin_weight
    b = jnp.zeros((V,), dtype=_input.dtype) if bias is None else bias
    tgt32 = target.astype(jnp.int32)
    if BT_pad != BT:
        x = jnp.pad(x, ((0, BT_pad - BT), (0, 0)))
        tgt32 = jnp.pad(tgt32, ((0, BT_pad - BT),), constant_values=ignore_index)
    if v_padded:
        w = jnp.pad(w, ((0, V_pad - V), (0, 0)))
        b = jnp.pad(b, ((0, V_pad - V),))
    b2 = b.reshape(1, V_pad)
    tgt2 = tgt32.reshape(BT_pad, 1)

    # --- VMEM budget (lane-padding aware) -----------------------------------
    est = _estimate_vmem(tb, tv, H, x_isz, w_isz, b_isz, n_scratch)
    vmem_limit = int(min(0.92 * vmem_cap, max(1.3 * est + (4 << 20), 32 << 20)))
    vmem_limit = int(min(max(vmem_limit, 1.1 * est), vmem_cap))

    kernel = functools.partial(
        _flce_kernel, tv=tv, vocab_size=V, v_padded=v_padded,
        ignore_index=ignore_index, lse_square_scale=lse_square_scale,
        label_smoothing=label_smoothing, softcap=softcap,
        inv_softcap=(None if softcap is None else 1.0 / softcap))

    scratch = [
        pltpu.VMEM((tb, 1), jnp.float32),   # running max
        pltpu.VMEM((tb, 1), jnp.float32),   # running sum-exp
        pltpu.VMEM((tb, 1), jnp.float32),   # target logit
    ]
    if label_smoothing > 0.0:
        scratch.append(pltpu.VMEM((tb, 1), jnp.float32))  # running sum of logits

    n_tok_blocks = BT_pad // tb
    cost = pl.CostEstimate(
        flops=int(2 * BT_pad * V_pad * H),
        transcendentals=int(BT_pad * V_pad * (2 if softcap is not None else 1)),
        bytes_accessed=int(n_tok_blocks * V_pad * H * w_isz   # weight re-streaming
                           + BT_pad * H * x_isz
                           + n_tok_blocks * V_pad * b_isz
                           + BT_pad * 4 + BT_pad * 4))

    per_token = pl.pallas_call(
        kernel,
        out_shape=jax.ShapeDtypeStruct((BT_pad, 1), jnp.float32),
        grid_spec=pltpu.PrefetchScalarGridSpec(
            num_scalar_prefetch=0,
            grid=(n_tok_blocks, V_pad // tv),
            in_specs=[
                pl.BlockSpec((tb, 1), lambda i, v: (i, 0)),     # target
                # _input block index is invariant across the vocab loop ->
                # single-buffer it to free tb*H*itemsize of VMEM.
                pl.BlockSpec((tb, H), lambda i, v: (i, 0),
                             pipeline_mode=pl.Buffered(1)),     # _input
                pl.BlockSpec((tv, H), lambda i, v: (v, 0)),     # lin_weight
                pl.BlockSpec((1, tv), lambda i, v: (0, v)),     # bias
            ],
            out_specs=pl.BlockSpec((tb, 1), lambda i, v: (i, 0)),
            scratch_shapes=scratch,
        ),
        compiler_params=pltpu.CompilerParams(
            dimension_semantics=("parallel", "arbitrary"),
            vmem_limit_bytes=vmem_limit),
        cost_estimate=cost,
    )(tgt2, x, w, b2)

    per_token = per_token.reshape(BT_pad)[:BT]
    if reduction == "none":
        return per_token
    total = jnp.sum(per_token)
    if reduction == "sum":
        return total
    # 'mean': divide by number of non-ignored tokens (Liger semantics).
    n_valid = jnp.sum((target != ignore_index).astype(jnp.float32))
    return total / jnp.maximum(n_valid, 1.0)


# ------------------------------------------------------------------------ reference
def _reference(lin_weight, _input, target, bias, *, ignore_index,
               lse_square_scale, label_smoothing, reduction, softcap):
    logits = _input.astype(jnp.float32) @ lin_weight.astype(jnp.float32).T
    logits = logits + bias.astype(jnp.float32)[None, :]
    if softcap is not None:
        logits = softcap * jnp.tanh(logits / softcap)
    V = logits.shape[-1]
    lse = jax.scipy.special.logsumexp(logits, axis=-1)
    x_y = jnp.take_along_axis(
        logits, jnp.clip(target, 0, V - 1)[:, None].astype(jnp.int32), axis=-1)[:, 0]
    loss = lse - x_y
    if label_smoothing > 0:
        eps = label_smoothing
        loss = lse - (1 - eps) * x_y - (eps / V) * logits.sum(-1)
    loss = loss + lse_square_scale * lse * lse
    valid = target != ignore_index
    loss = jnp.where(valid, loss, 0.0)
    if reduction == "none":
        return loss
    if reduction == "sum":
        return loss.sum()
    return loss.sum() / jnp.maximum(valid.sum().astype(jnp.float32), 1.0)


if __name__ == "__main__":
    key = jax.random.PRNGKey(0)
    B, T, H, V = 2, 8, 64, 256
    BT = B * T

    k1, k2, k3, k4, k5, k6, k7, k8 = jax.random.split(key, 8)
    _input = jax.random.normal(k1, (BT, H), dtype=jnp.float32)
    lin_weight = jax.random.normal(k2, (V, H), dtype=jnp.float32) * 0.05
    bias = jax.random.normal(k3, (V,), dtype=jnp.float32) * 0.01
    target = jax.random.randint(k4, (BT,), 0, V, dtype=jnp.int32)
    ignore_index = -100
    target = target.at[3].set(ignore_index)  # exercise ignore_index path

    # Test 1: mean reduction + label smoothing + z-loss, multi-step vocab (tv=128).
    kw1 = dict(ignore_index=ignore_index, lse_square_scale=1e-4,
               label_smoothing=0.1, reduction="mean", softcap=None)
    loss1 = jax.block_until_ready(
        fused_linear_cross_entropy(lin_weight, _input, target, bias, tv=128, **kw1))
    ref1 = _reference(lin_weight, _input, target, bias, **kw1)
    assert jnp.allclose(loss1, ref1, rtol=1e-4, atol=1e-4), (loss1, ref1)

    # Test 2: softcap + 'none' reduction, auto-selected tiles.
    kw2 = dict(ignore_index=ignore_index, lse_square_scale=0.0,
               label_smoothing=0.0, reduction="none", softcap=30.0)
    loss2 = jax.block_until_ready(
        fused_linear_cross_entropy(lin_weight, _input, target, bias, **kw2))
    ref2 = _reference(lin_weight, _input, target, bias, **kw2)
    assert jnp.allclose(loss2, ref2, rtol=1e-4, atol=1e-4), (loss2, ref2)

    # Test 3: native bf16 operands (bf16 MXU path with f32 accumulation).
    xb = _input.astype(jnp.bfloat16)
    wb = lin_weight.astype(jnp.bfloat16)
    bb = bias.astype(jnp.bfloat16)
    loss3 = jax.block_until_ready(
        fused_linear_cross_entropy(wb, xb, target, bb, **kw1))
    ref3 = _reference(wb, xb, target, bb, **kw1)
    assert jnp.allclose(loss3, ref3, rtol=5e-3, atol=5e-3), (loss3, ref3)

    # Test 4: non-divisible BT and V -> pad + mask path (with softcap).
    BT2, V2 = 13, 200
    x2 = jax.random.normal(k5, (BT2, H), dtype=jnp.float32)
    w2 = jax.random.normal(k6, (V2, H), dtype=jnp.float32) * 0.05
    b2 = jax.random.normal(k7, (V2,), dtype=jnp.float32) * 0.01
    t2 = jax.random.randint(k8, (BT2,), 0, V2, dtype=jnp.int32)
    t2 = t2.at[1].set(ignore_index)
    kw4 = dict(ignore_index=ignore_index, lse_square_scale=0.0,
               label_smoothing=0.0, reduction="mean", softcap=30.0)
    loss4 = jax.block_until_ready(
        fused_linear_cross_entropy(w2, x2, t2, b2, **kw4))
    ref4 = _reference(w2, x2, t2, b2, **kw4)
    assert jnp.allclose(loss4, ref4, rtol=1e-4, atol=1e-4), (loss4, ref4)

    print("KERNEL_OK")
</pallas_src>

<mosaic_0001>
module attributes {stable_mosaic.version = 11 : i64} {
  func.func @_flce_kernel(%arg0: i32, %arg1: i32, %arg2: memref<16x1xi32, #tpu.memory_space<vmem>>, %arg3: memref<16x64xf32, #tpu.memory_space<vmem>>, %arg4: memref<128x64xf32, #tpu.memory_space<vmem>>, %arg5: memref<1x128xf32, #tpu.memory_space<vmem>>, %arg6: memref<16x1xf32, #tpu.memory_space<vmem>>, %arg7: memref<16x1xf32, #tpu.memory_space<vmem>>, %arg8: memref<16x1xf32, #tpu.memory_space<vmem>>, %arg9: memref<16x1xf32, #tpu.memory_space<vmem>>, %arg10: memref<16x1xf32, #tpu.memory_space<vmem>>) attributes {dimension_semantics = [#tpu.dimension_semantics<parallel>, #tpu.dimension_semantics<arbitrary>], iteration_bounds = array<i64: 1, 2>, scalar_prefetch = 0 : i64, scratch_operands = 4 : i64, tpu.core_type = #tpu.core_type<tc>, window_params = [{transform_indices = @transform_0, window_bounds = array<i64: 16, 1>}, {pipeline_mode = #tpu.pipeline_mode<synchronous>, transform_indices = @transform_1, window_bounds = array<i64: 16, 64>}, {transform_indices = @transform_2, window_bounds = array<i64: 128, 64>}, {transform_indices = @transform_3, window_bounds = array<i64: 1, 128>}, {transform_indices = @transform_4, window_bounds = array<i64: 16, 1>}]} {
    %c0_i32 = arith.constant 0 : i32
    %0 = arith.cmpi eq, %arg1, %c0_i32 : i32
    %1 = arith.extui %0 : i1 to i32
    %c0_i32_0 = arith.constant 0 : i32
    %2 = arith.cmpi ne, %1, %c0_i32_0 : i32
    scf.if %2 {
      %cst_30 = arith.constant 0xFF800000 : f32
      %47 = vector.broadcast %cst_30 : f32 to vector<16x1xf32>
      %c0_31 = arith.constant 0 : index
      %c0_32 = arith.constant 0 : index
      %48 = vector.load %arg7[%c0_31, %c0_32] : memref<16x1xf32, #tpu.memory_space<vmem>>, vector<16x1xf32>
      tpu.vector_store %arg7[%c0_31, %c0_32], %47 {strides = array<i32>} : memref<16x1xf32, #tpu.memory_space<vmem>>, vector<16x1xf32>,
      %cst_33 = arith.constant 0.000000e+00 : f32
      %49 = vector.broadcast %cst_33 : f32 to vector<16x1xf32>
      %c0_34 = arith.constant 0 : index
      %c0_35 = arith.constant 0 : index
      %50 = vector.load %arg8[%c0_34, %c0_35] : memref<16x1xf32, #tpu.memory_space<vmem>>, vector<16x1xf32>
      tpu.vector_store %arg8[%c0_34, %c0_35], %49 {strides = array<i32>} : memref<16x1xf32, #tpu.memory_space<vmem>>, vector<16x1xf32>,
      %cst_36 = arith.constant 0.000000e+00 : f32
      %51 = vector.broadcast %cst_36 : f32 to vector<16x1xf32>
      %c0_37 = arith.constant 0 : index
      %c0_38 = arith.constant 0 : index
      %52 = vector.load %arg9[%c0_37, %c0_38] : memref<16x1xf32, #tpu.memory_space<vmem>>, vector<16x1xf32>
      tpu.vector_store %arg9[%c0_37, %c0_38], %51 {strides = array<i32>} : memref<16x1xf32, #tpu.memory_space<vmem>>, vector<16x1xf32>,
      %cst_39 = arith.constant 0.000000e+00 : f32
      %53 = vector.broadcast %cst_39 : f32 to vector<16x1xf32>
      %c0_40 = arith.constant 0 : index
      %c0_41 = arith.constant 0 : index
      %54 = vector.load %arg10[%c0_40, %c0_41] : memref<16x1xf32, #tpu.memory_space<vmem>>, vector<16x1xf32>
      tpu.vector_store %arg10[%c0_40, %c0_41], %53 {strides = array<i32>} : memref<16x1xf32, #tpu.memory_space<vmem>>, vector<16x1xf32>,
    } else {
    }
    %c0 = arith.constant 0 : index
    %c0_1 = arith.constant 0 : index
    %3 = vector.load %arg3[%c0, %c0_1] : memref<16x64xf32, #tpu.memory_space<vmem>>, vector<16x64xf32>
    %c0_2 = arith.constant 0 : index
    %c0_3 = arith.constant 0 : index
    %4 = vector.load %arg4[%c0_2, %c0_3] : memref<128x64xf32, #tpu.memory_space<vmem>>, vector<128x64xf32>
    %cst = arith.constant dense<0.000000e+00> : vector<16x128xf32>
    %5 = tpu.matmul %3, %4, %cst {dimension_numbers = #tpu.dot_dimension_numbers<[1], [1], [0], [0], [0, 0, 1, 0], [], []>} : vector<16x64xf32>, vector<128x64xf32>, vector<16x128xf32> -> vector<16x128xf32>
    %c0_4 = arith.constant 0 : index
    %c0_5 = arith.constant 0 : index
    %6 = vector.load %arg5[%c0_4, %c0_5] : memref<1x128xf32, #tpu.memory_space<vmem>>, vector<1x128xf32>
    %7 = vector.broadcast %6 : vector<1x128xf32> to vector<16x128xf32>
    %8 = arith.addf %5, %7 : vector<16x128xf32>
    %9 = tpu.iota {dimensions = array<i32: 1>} : vector<16x128xi32>
    %c0_6 = arith.constant 0 : index
    %c0_7 = arith.constant 0 : index
    %10 = vector.load %arg7[%c0_6, %c0_7] : memref<16x1xf32, #tpu.memory_space<vmem>>, vector<16x1xf32>
    %cst_8 = arith.constant dense<0xFF800000> : vector<16xf32>
    %11 = vector.multi_reduction <maximumf>, %8, %cst_8 [1] : vector<16x128xf32> to vector<16xf32>
    %12 = vector.shape_cast %11 : vector<16xf32> to vector<16x1xf32>
    %13 = arith.maximumf %10, %12 : vector<16x1xf32>
    %14 = vector.broadcast %13 : vector<16x1xf32> to vector<16x128xf32>
    %15 = arith.subf %8, %14 : vector<16x128xf32>
    %16 = math.exp %15 : vector<16x128xf32>
    %17 = arith.subf %10, %13 : vector<16x1xf32>
    %18 = math.exp %17 : vector<16x1xf32>
    %c0_9 = arith.constant 0 : index
    %c0_10 = arith.constant 0 : index
    %19 = vector.load %arg8[%c0_9, %c0_10] : memref<16x1xf32, #tpu.memory_space<vmem>>, vector<16x1xf32>
    %20 = arith.mulf %18, %19 : vector<16x1xf32>
    %cst_11 = arith.constant dense<0.000000e+00> : vector<16xf32>
    %21 = vector.multi_reduction <add>, %16, %cst_11 [1] : vector<16x128xf32> to vector<16xf32>
    %22 = vector.shape_cast %21 : vector<16xf32> to vector<16x1xf32>
    %23 = arith.addf %20, %22 : vector<16x1xf32>
    %c0_12 = arith.constant 0 : index
    %c0_13 = arith.constant 0 : index
    %24 = vector.load %arg8[%c0_12, %c0_13] : memref<16x1xf32, #tpu.memory_space<vmem>>, vector<16x1xf32>
    tpu.vector_store %arg8[%c0_12, %c0_13], %23 {strides = array<i32>} : memref<16x1xf32, #tpu.memory_space<vmem>>, vector<16x1xf32>,
    %c0_14 = arith.constant 0 : index
    %c0_15 = arith.constant 0 : index
    %25 = vector.load %arg7[%c0_14, %c0_15] : memref<16x1xf32, #tpu.memory_space<vmem>>, vector<16x1xf32>
    tpu.vector_store %arg7[%c0_14, %c0_15], %13 {strides = array<i32>} : memref<16x1xf32, #tpu.memory_space<vmem>>, vector<16x1xf32>,
    %c0_16 = arith.constant 0 : index
    %c0_17 = arith.constant 0 : index
    %26 = vector.load %arg10[%c0_16, %c0_17] : memref<16x1xf32, #tpu.memory_space<vmem>>, vector<16x1xf32>
    %cst_18 = arith.constant dense<0.000000e+00> : vector<16xf32>
    %27 = vector.multi_reduction <add>, %8, %cst_18 [1] : vector<16x128xf32> to vector<16xf32>
    %28 = vector.shape_cast %27 : vector<16xf32> to vector<16x1xf32>
    %29 = arith.addf %26, %28 : vector<16x1xf32>
    %c0_19 = arith.constant 0 : index
    %c0_20 = arith.constant 0 : index
    %30 = vector.load %arg10[%c0_19, %c0_20] : memref<16x1xf32, #tpu.memory_space<vmem>>, vector<16x1xf32>
    tpu.vector_store %arg10[%c0_19, %c0_20], %29 {strides = array<i32>} : memref<16x1xf32, #tpu.memory_space<vmem>>, vector<16x1xf32>,
    %c0_21 = arith.constant 0 : index
    %c0_22 = arith.constant 0 : index
    %31 = vector.load %arg2[%c0_21, %c0_22] : memref<16x1xi32, #tpu.memory_space<vmem>>, vector<16x1xi32>
    %c128_i32 = arith.constant 128 : i32
    %32 = arith.muli %arg1, %c128_i32 : i32
    %33 = vector.broadcast %32 : i32 to vector<16x1xi32>
    %34 = arith.subi %31, %33 : vector<16x1xi32>
    %c0_23 = arith.constant 0 : index
    %c0_24 = arith.constant 0 : index
    %35 = vector.load %arg9[%c0_23, %c0_24] : memref<16x1xf32, #tpu.memory_space<vmem>>, vector<16x1xf32>
    %36 = vector.broadcast %34 : vector<16x1xi32> to vector<16x128xi32>
    %37 = arith.cmpi eq, %9, %36 : vector<16x128xi32>
    %cst_25 = arith.constant 0.000000e+00 : f32
    %38 = vector.broadcast %cst_25 : f32 to vector<16x128xf32>
    %39 = arith.select %37, %8, %38 : vector<16x128xi1>, vector<16x128xf32>
    %cst_26 = arith.constant dense<0.000000e+00> : vector<16xf32>
    %40 = vector.multi_reduction <add>, %39, %cst_26 [1] : vector<16x128xf32> to vector<16xf32>
    %41 = vector.shape_cast %40 : vector<16xf32> to vector<16x1xf32>
    %42 = arith.addf %35, %41 : vector<16x1xf32>
    %c0_27 = arith.constant 0 : index
    %c0_28 = arith.constant 0 : index
    %43 = vector.load %arg9[%c0_27, %c0_28] : memref<16x1xf32, #tpu.memory_space<vmem>>, vector<16x1xf32>
    tpu.vector_store %arg9[%c0_27, %c0_28], %42 {strides = array<i32>} : memref<16x1xf32, #tpu.memory_space<vmem>>, vector<16x1xf32>,
    %c1_i32 = arith.constant 1 : i32
    %44 = arith.cmpi eq, %arg1, %c1_i32 : i32
    %45 = arith.extui %44 : i1 to i32
    %c0_i32_29 = arith.constant 0 : i32
    %46 = arith.cmpi ne, %45, %c0_i32_29 : i32
    scf.if %46 {
      %c0_30 = arith.constant 0 : index
      %c0_31 = arith.constant 0 : index
      %47 = vector.load %arg7[%c0_30, %c0_31] : memref<16x1xf32, #tpu.memory_space<vmem>>, vector<16x1xf32>
      %c0_32 = arith.constant 0 : index
      %c0_33 = arith.constant 0 : index
      %48 = vector.load %arg8[%c0_32, %c0_33] : memref<16x1xf32, #tpu.memory_space<vmem>>, vector<16x1xf32>
      %49 = math.log %48 : vector<16x1xf32>
      %50 = arith.addf %47, %49 : vector<16x1xf32>
      %c0_34 = arith.constant 0 : index
      %c0_35 = arith.constant 0 : index
      %51 = vector.load %arg9[%c0_34, %c0_35] : memref<16x1xf32, #tpu.memory_space<vmem>>, vector<16x1xf32>
      %52 = arith.subf %50, %51 : vector<16x1xf32>
      %cst_36 = arith.constant 0.899999976 : f32
      %53 = vector.broadcast %cst_36 : f32 to vector<16x1xf32>
      %54 = arith.mulf %53, %52 : vector<16x1xf32>
      %cst_37 = arith.constant 1.000000e-01 : f32
      %55 = vector.broadcast %cst_37 : f32 to vector<16x1xf32>
      %56 = arith.mulf %55, %50 : vector<16x1xf32>
      %57 = arith.addf %54, %56 : vector<16x1xf32>
      %c0_38 = arith.constant 0 : index
      %c0_39 = arith.constant 0 : index
      %58 = vector.load %arg10[%c0_38, %c0_39] : memref<16x1xf32, #tpu.memory_space<vmem>>, vector<16x1xf32>
      %cst_40 = arith.constant 3.906250e-04 : f32
      %59 = vector.broadcast %cst_40 : f32 to vector<16x1xf32>
      %60 = arith.mulf %59, %58 : vector<16x1xf32>
      %61 = arith.subf %57, %60 : vector<16x1xf32>
      %cst_41 = arith.constant 9.99999974E-5 : f32
      %62 = vector.broadcast %cst_41 : f32 to vector<16x1xf32>
      %63 = arith.mulf %62, %50 : vector<16x1xf32>
      %64 = arith.mulf %63, %50 : vector<16x1xf32>
      %65 = arith.addf %61, %64 : vector<16x1xf32>
      %c0_42 = arith.constant 0 : index
      %c0_43 = arith.constant 0 : index
      %66 = vector.load %arg2[%c0_42, %c0_43] : memref<16x1xi32, #tpu.memory_space<vmem>>, vector<16x1xi32>
      %c-100_i32 = arith.constant -100 : i32
      %67 = vector.broadcast %c-100_i32 : i32 to vector<16x1xi32>
      %68 = arith.cmpi ne, %66, %67 : vector<16x1xi32>
      %cst_44 = arith.constant 0.000000e+00 : f32
      %69 = vector.broadcast %cst_44 : f32 to vector<16x1xf32>
      %70 = arith.select %68, %65, %69 : vector<16x1xi1>, vector<16x1xf32>
      %c0_45 = arith.constant 0 : index
      %c0_46 = arith.constant 0 : index
      %71 = vector.load %arg6[%c0_45, %c0_46] : memref<16x1xf32, #tpu.memory_space<vmem>>, vector<16x1xf32>
      tpu.vector_store %arg6[%c0_45, %c0_46], %70 {strides = array<i32>} : memref<16x1xf32, #tpu.memory_space<vmem>>, vector<16x1xf32>,
    } else {
    }
    return
  }
  func.func @transform_0(%arg0: i32, %arg1: i32) -> (i32, i32) {
    %c0_i32 = arith.constant 0 : i32
    %c0_i32_0 = arith.constant 0 : i32
    return %arg0, %c0_i32 : i32, i32
  }
  func.func @transform_1(%arg0: i32, %arg1: i32) -> (i32, i32) {
    %c0_i32 = arith.constant 0 : i32
    %c0_i32_0 = arith.constant 0 : i32
    return %arg0, %c0_i32 : i32, i32
  }
  func.func @transform_2(%arg0: i32, %arg1: i32) -> (i32, i32) {
    %c0_i32 = arith.constant 0 : i32
    %c0_i32_0 = arith.constant 0 : i32
    return %arg1, %c0_i32 : i32, i32
  }
  func.func @transform_3(%arg0: i32, %arg1: i32) -> (i32, i32) {
    %c0_i32 = arith.constant 0 : i32
    %c0_i32_0 = arith.constant 0 : i32
    return %c0_i32, %arg1 : i32, i32
  }
  func.func @transform_4(%arg0: i32, %arg1: i32) -> (i32, i32) {
    %c0_i32 = arith.constant 0 : i32
    %c0_i32_0 = arith.constant 0 : i32
    return %arg0, %c0_i32 : i32, i32
  }
}

</mosaic_0001>

<bundles_post_ra>
// kernel: tpu_custom_call.1
= control target key start
LH: loop header
LB: loop body
LE: loop exit
PB: predicated region body
PF: predicated region fallthrough
CT: control target
= control target key end

     0   :  { %s895_s15 = smov 0   ;;  %s897_s16 = smov 0   ;;  %s1036_s0 = inlined_call_operand.vmem [shape: s32[16,1], index: 0, kind: input, shape index: {}]   ;;  %s1037_s1 = inlined_call_operand.vmem [shape: f32[16,64], index: 1, kind: input, shape index: {}]   ;;  %s1038_s2 = inlined_call_operand.vmem [shape: f32[256,64], index: 2, kind: input, shape index: {}]   ;;  %s1039_s3 = inlined_call_operand.vmem [shape: f32[1,256], index: 3, kind: input, shape index: {}]   ;;  %s1040_s4 = inlined_call_operand.vmem [shape: f32[16,1], index: 4, kind: output, shape index: {}]  }
   0x1   :  { %s899_s17 = smov 0  }
   0x2 LB: > { %s23_s18 = sadd.s32 1, %s861_s16  ;;  %p672_p0 = scmp.ge.s32.totalorder %s865_s17, 1  ;;  %s865_s17 = sphi %s899_s17, %s14_s17   ;;  %s861_s16 = sphi %s897_s16, %s1044_s16   ;;  %s857_s15 = sphi %s895_s15, %s1043_s15  }
   0x3   : > { %p24_p1 = scmp.ge.s32.totalorder %s23_s18, 2  ;;  %p205_p2 = scmp.lt.s32.totalorder %s865_s17, 3 }
   0x5   : > { %s1046_s18 = smov (%p24_p1, %s23_s18), 0  ;;  %p206_p3 = pnand %p672_p0, %p205_p2 }
   0x6   : > { %s673_s19 = sshll.u32 (!%p206_p3), %s857_s15, 4  ;;  %p262_p4 = scmp.lt.s32.totalorder (!%p206_p3), %s857_s15, 1 }
   0x7   : > { %209 = sbr.rel (%p206_p3) target bundleno = 779 (0x30b), region = 36  ;;  %p257_p5 = scmp.lt.s32.totalorder (!%p206_p3), %s673_s19, 31 }
   0x8   : > { %p675_p6 = scmp.ne.s32.totalorder (!%p206_p3), %s857_s15, 0 }
   0xe   : > { %s918_s20 = scalar_select %p262_p4, %s857_s15, 1 }
   0xf   : > { %s1048_s19 = smov (!%p257_p5, %s673_s19), 31  ;;  %274 = sbr.rel (%p675_p6) target bundleno = 22 (0x16), region = 40 }
  0x10   : > { %s264_s23 = scalar_lea.vmem %s1039_s3, %s918_s20  ;;  %s674_s24 = sshll.u32 %s1048_s19, 3  ;;  %vm275_vm0 = vcmask (!%p675_p6), 7168   ;;  %v867_v0 = vmov (!%p675_p6), -inf   ;;  %v868_v1 = vmov (!%p675_p6), 0.0  }
  0x11   : > { %s927_s27 = scalar_lea.vmem %s1038_s2, %s674_s24  ;;  %276 = vst.msk [vmem:[#allocation2] sm:$0xff] (!%p675_p6), %vm275_vm0, %v867_v0  ;;  %277 = vst.msk [vmem:[#allocation2 + $0x8] sm:$0xff] (!%p675_p6), %vm275_vm0, %v867_v0 }
  0x12   : > { %278 = vst.msk [vmem:[#allocation3] sm:$0xff] (!%p675_p6), %vm275_vm0, %v868_v1  ;;  %279 = vst.msk [vmem:[#allocation3 + $0x8] sm:$0xff] (!%p675_p6), %vm275_vm0, %v868_v1 }
  0x13   : > { %280 = vst.msk [vmem:[#allocation4] sm:$0xff] (!%p675_p6), %vm275_vm0, %v868_v1  ;;  %281 = vst.msk [vmem:[#allocation4 + $0x8] sm:$0xff] (!%p675_p6), %vm275_vm0, %v868_v1 }
  0x14   : > { %282 = vst.msk [vmem:[#allocation5] sm:$0xff] (!%p675_p6), %vm275_vm0, %v868_v1  ;;  %283 = vst.msk [vmem:[#allocation5 + $0x8] sm:$0xff] (!%p675_p6), %vm275_vm0, %v868_v1 }
  0x16 PF: > { %v286_v2 = vld [vmem:[%s927_s27] sm:$0xff]  ;;  %v287_v3 = vld [vmem:[%s927_s27 + $0x8] sm:$0xff]  ;;  %vm309_vm1 = vcmask 523264   ;;  %v288_v4 = vld [vmem:[%s927_s27 + $0x10] sm:$0xff]  ;;  %v869_v29 = vmov 0   ;;  %s695_s8 = sshll.u32 %s857_s15, 7  ;;  %v439_v48 = vlaneseq }
  0x17   : > { %v754_v5 = vpack.c.bf16 %v287_v3, %v286_v2  ;;  %vm935_vm2 = vmpackc.low %vm309_vm1, %vm309_vm1  ;;  %v289_v7 = vld [vmem:[%s927_s27 + $0x18] sm:$0xff]  ;;  %v284_v9 = vld [vmem:[%s1037_s1] sm:$0xff]  ;;  %830 = vset.pattern.permute.xlu0 %v869_v29  ;;  %829 = vset.pattern.permute.xlu1 %v869_v29  ;;  %v499_v36 = vstv %s695_s8  ;;  %vm481_vm3 = vcmask 7168   ;;  %p696_p7 = scmp.ne.s32.totalorder %s857_s15, 1 }
  0x18   : > { %v760_v8 = vpack.c.bf16 %v289_v7, %v288_v4  ;;  %v290_v10 = vld [vmem:[%s927_s27 + $0x20] sm:$0xff]  ;;  %v291_v11 = vld [vmem:[%s927_s27 + $0x28] sm:$0xff]  ;;  %751 = vmatprep.mubr.msk.f32.mxu0 %vm309_vm1, %v284_v9  ;;  %v292_v13 = vld [vmem:[%s927_s27 + $0x30] sm:$0xff]  ;;  %v440_v49 = vand.u32 127, %v439_v48 }
  0x19   : > { %756 = vmatprep.subr.msk.bf16.mxu0 %vm935_vm2, %v754_v5  ;;  %v766_v12 = vpack.c.bf16 %v291_v11, %v290_v10  ;;  %v293_v14 = vld [vmem:[%s927_s27 + $0x38] sm:$0xff]  ;;  %v294_v16 = vld [vmem:[%s927_s27 + $0x40] sm:$0xff]  ;;  %v295_v17 = vld [vmem:[%s927_s27 + $0x48] sm:$0xff] }
  0x1a   : > { %759 = vmatpush3.bf16.xpose.msk.msra.mxu0 %vm935_vm2, %v754_v5  ;;  %v772_v15 = vpack.c.bf16 %v293_v14, %v292_v13  ;;  %v778_v18 = vpack.c.bf16 %v295_v17, %v294_v16  ;;  %v296_v19 = vld [vmem:[%s927_s27 + $0x50] sm:$0xff]  ;;  %v297_v20 = vld [vmem:[%s927_s27 + $0x58] sm:$0xff]  ;;  %v298_v22 = vld [vmem:[%s927_s27 + $0x60] sm:$0xff] }
  0x1b   : > { %762 = vmatprep.subr.msk.bf16.mxu0 %vm935_vm2, %v760_v8  ;;  %v784_v21 = vpack.c.bf16 %v297_v20, %v296_v19  ;;  %v299_v23 = vld [vmem:[%s927_s27 + $0x68] sm:$0xff]  ;;  %v300_v25 = vld [vmem:[%s927_s27 + $0x70] sm:$0xff]  ;;  %v301_v26 = vld [vmem:[%s927_s27 + $0x78] sm:$0xff] }
  0x1c   : > { %v790_v24 = vpack.c.bf16 %v299_v23, %v298_v22  ;;  %v796_v27 = vpack.c.bf16 %v301_v26, %v300_v25  ;;  %v285_v28 = vld [vmem:[%s1037_s1 + $0x8] sm:$0xff]  ;;  %v676_v30 = vld [vmem:[%s264_s23] ss:$0 sm:$0xff]  ;;  %v486_v52 = vld [vmem:[#allocation5] sm:$0xff] }
  0x1d   : > { %v496_v35 = vld [vmem:[%s1036_s0] sm:$0xff]  ;;  %v442_v41 = vld [vmem:[#allocation2 + $0x8] sm:$0xff]  ;;  %v487_v1 = vld [vmem:[#allocation5 + $0x8] sm:$0xff] }
  0x1e   : > { %v500_v37 = vsub.s32 %v496_v35, %v499_v36  ;;  %v441_v38 = vld [vmem:[#allocation2] sm:$0xff]  ;;  %v497_v44 = vld [vmem:[%s1036_s0 + $0x8] sm:$0xff]  ;;  %v472_v10 = vld [vmem:[#allocation3 + $0x8] sm:$0xff] }
  0x1f   : > { %v501_v47 = vsub.s32 %v497_v44, %v499_v36  ;;  %v502_v4 = vld [vmem:[#allocation4] sm:$0xff]  ;;  %v471_v14 = vld [vmem:[#allocation3] sm:$0xff]  ;;  %v503_v19 = vld [vmem:[#allocation4 + $0x8] sm:$0xff] }
  0x22   : > { %765 = vmatpush3.bf16.xpose.msk.msra.mxu0 %vm935_vm2, %v760_v8 }
  0x23   : > { %768 = vmatprep.subr.msk.bf16.mxu0 %vm935_vm2, %v766_v12 }
  0x2a   : > { %771 = vmatpush3.bf16.xpose.msk.msra.mxu0 %vm935_vm2, %v766_v12 }
  0x2b   : > { %774 = vmatprep.subr.msk.bf16.mxu0 %vm935_vm2, %v772_v15 }
  0x32   : > { %777 = vmatpush3.bf16.xpose.msk.msra.mxu0 %vm935_vm2, %v772_v15 }
  0x33   : > { %780 = vmatprep.subr.msk.bf16.mxu0 %vm935_vm2, %v778_v18 }
  0x3a   : > { %783 = vmatpush3.bf16.xpose.msk.msra.mxu0 %vm935_vm2, %v778_v18 }
  0x3b   : > { %786 = vmatprep.subr.msk.bf16.mxu0 %vm935_vm2, %v784_v21 }
  0x42   : > { %789 = vmatpush3.bf16.xpose.msk.msra.mxu0 %vm935_vm2, %v784_v21 }
  0x43   : > { %792 = vmatprep.subr.msk.bf16.mxu0 %vm935_vm2, %v790_v24 }
  0x4a   : > { %795 = vmatpush3.bf16.xpose.msk.msra.mxu0 %vm935_vm2, %v790_v24 }
  0x4b   : > { %798 = vmatprep.subr.msk.bf16.mxu0 %vm935_vm2, %v796_v27 }
  0x52   : > { %801 = vmatpush3.bf16.xpose.msk.msra.mxu0 %vm935_vm2, %v796_v27 }
  0x59   : > { %752 = vmatmul.mubr.msk.f32.vlgmr.msra.gmra.mrb[0].mxu0 %vm309_vm1, %v285_v28 }
 0x12c   : > { %v753_v31 = vpop.f32.mrb[0].mxu0 }
 0x12d   : > { %v430_v32 = vpop.f32.mrb[1].mxu0  ;;  %v436_v34 = vadd.f32 %v753_v31, %v676_v30 }
 0x12e   : > { %v431_v33 = vadd.f32 %v676_v30, %v430_v32 }
 0x130   : > { %443 = vmax.xlane.f32.xlu0 %v431_v33 }
 0x134   : > { %445 = vmax.xlane.f32.xlu0 %v436_v34 }
 0x14a   : > { %505 = vperm.xlu0 %830, %v500_v37  }
 0x169   : > { %488 = vadd.xlane.f32.xlu0 %v431_v33 }
 0x1bd   : > { %v444_v39 = vpop.xlane.xlu0 %443 }
 0x1be   : > { %v447_v40 = vmax.f32 %v441_v38, %v444_v39 }
 0x1c0   : > { %v465_v42 = vsub.f32 %v441_v38, %v447_v40  ;;  %484 = vst.msk [vmem:[#allocation2] sm:$0xff] %vm481_vm3, %v447_v40  ;;  %451 = vperm.xlu1 %829, %v447_v40  }
 0x1c1   : > { %v446_v43 = vpop.xlane.xlu0 %445 }
 0x1c2   : > { %v448_v45 = vmax.f32 %v442_v41, %v446_v43  ;;  %v467_v8 = vmul.f32 1.442695, %v465_v42 }
 0x1c4   : > { %v466_v46 = vsub.f32 %v442_v41, %v448_v45  ;;  %485 = vst.msk [vmem:[#allocation2 + $0x8] sm:$0xff] %vm481_vm3, %v448_v45  ;;  %456 = vperm.xlu1 %829, %v448_v45  }
 0x1c6   : > { %v469_v7 = vmul.f32 1.442695, %v466_v46  ;;  %v558_v46 = vld [vmem:[%s1036_s0] sm:$0xff] (!%p696_p7) }
 0x1c7   : > { %v526_v25 = vld [vmem:[#allocation2] sm:$0xff] (!%p696_p7)  ;;  %vm560_vm6 = vcmp.ne.s32.totalorder (!%p696_p7), %v558_v46, 4294967196 }
 0x1c8   : > { %508 = vperm.xlu1 %829, %v501_v47  }
 0x1c9   : > { %v506_v50 = vpop.permute.xlu0 %505 }
 0x1ca   : > { %vm510_vm4 = vcmp.eq.s32.totalorder %v440_v49, %v506_v50 }
 0x1cb   : > { %v512_v51 = vsel %vm510_vm4, %v431_v33, 0.0  ;;  %v527_v29 = vld [vmem:[#allocation2 + $0x8] sm:$0xff] (!%p696_p7) }
 0x1ec   : > { %490 = vadd.xlane.f32.xlu1 %v436_v34 }
 0x1f0   : > { %514 = vadd.xlane.f32.xlu1 %v512_v51 }
 0x1f6   : > { %v489_v53 = vpop.xlane.xlu0 %488 }
 0x1f7   : > { %v492_v54 = vadd.f32 %v489_v53, %v486_v52  ;;  %v559_v52 = vld [vmem:[%s1036_s0 + $0x8] sm:$0xff] (!%p696_p7) }
 0x1f8   : > { %vm561_vm7 = vcmp.ne.s32.totalorder (!%p696_p7), %v559_v52, 4294967196 }
 0x1f9   : > { %494 = vst.msk [vmem:[#allocation5] sm:$0xff] %vm481_vm3, %v492_v54 }
 0x200   : > { %v546_v32 = vld [vmem:[#allocation5] sm:$0xff] (!%p696_p7) }
 0x201   : > { %v548_v40 = vmul.f32 (!%p696_p7), 0.000390625, %v546_v32 }
 0x23f   : > { %v452_v55 = vpop.permute.xlu1 %451 }
 0x240   : > { %v459_v57 = vsub.f32 %v431_v33, %v452_v55 }
 0x242   : > { %v461_v60 = vmul.f32 1.442695, %v459_v57 }
 0x243   : > { %v457_v56 = vpop.permute.xlu1 %456 }
 0x244   : > { %v460_v58 = vsub.f32 %v436_v34, %v457_v56 }
 0x246   : > { %v463_v59 = vmul.f32 1.442695, %v460_v58 }
 0x247   : > { %v509_v62 = vpop.permute.xlu1 %508 }
 0x248   : > { %831 = vpow2.f32 %v463_v59  ;;  %vm511_vm5 = vcmp.eq.s32.totalorder %v440_v49, %v509_v62 }
 0x249   : > { %833 = vpow2.f32 %v461_v60  ;;  %v513_v0 = vsel %vm511_vm5, %v436_v34, 0.0 }
 0x24a   : > { %835 = vpow2.f32 %v469_v7 }
 0x24b   : > { %837 = vpow2.f32 %v467_v8 }
 0x252   : > { %v832_v61 = vpop.eup %831 }
 0x253   : > { %477 = vadd.xlane.f32.xlu1 %v832_v61  ;;  %v834_v63 = vpop.eup %833 }
 0x254   : > { %v836_v9 = vpop.eup %835 }
 0x255   : > { %v474_v11 = vmul.f32 %v836_v9, %v472_v10  ;;  %v838_v12 = vpop.eup %837 }
 0x256   : > { %v473_v16 = vmul.f32 %v838_v12, %v471_v14 }
 0x257   : > { %475 = vadd.xlane.f32.xlu1 %v834_v63 }
 0x25b   : > { %516 = vadd.xlane.f32.xlu1 %v513_v0 }
 0x279   : > { %v491_v2 = vpop.xlane.xlu1 %490 }
 0x27a   : > { %v493_v3 = vadd.f32 %v491_v2, %v487_v1 }
 0x27c   : > { %495 = vst.msk [vmem:[#allocation5 + $0x8] sm:$0xff] %vm481_vm3, %v493_v3 }
 0x27d   : > { %v515_v5 = vpop.xlane.xlu1 %514 }
 0x27e   : > { %v518_v6 = vadd.f32 %v515_v5, %v502_v4 }
 0x280   : > { %520 = vst.msk [vmem:[#allocation4] sm:$0xff] %vm481_vm3, %v518_v6 }
 0x283   : > { %v547_v38 = vld [vmem:[#allocation5 + $0x8] sm:$0xff] (!%p696_p7) }
 0x284   : > { %v549_v48 = vmul.f32 (!%p696_p7), 0.000390625, %v547_v38 }
 0x287   : > { %v536_v28 = vld [vmem:[#allocation4] sm:$0xff] (!%p696_p7) }
 0x2e0   : > { %v478_v13 = vpop.xlane.xlu1 %477 }
 0x2e1   : > { %v480_v15 = vadd.f32 %v478_v13, %v474_v11 }
 0x2e3   : > { %483 = vst.msk [vmem:[#allocation3 + $0x8] sm:$0xff] %vm481_vm3, %v480_v15 }
 0x2e4   : > { %v476_v17 = vpop.xlane.xlu1 %475 }
 0x2e5   : > { %v479_v18 = vadd.f32 %v476_v17, %v473_v16  ;;  %525 = sbr.rel (%p696_p7) target bundleno = 779 (0x30b), region = 44 }
 0x2e7   : > { %482 = vst.msk [vmem:[#allocation3] sm:$0xff] %vm481_vm3, %v479_v18 }
 0x2e8   : > { %v517_v20 = vpop.xlane.xlu1 %516 }
 0x2e9   : > { %v519_v21 = vadd.f32 %v517_v20, %v503_v19 }
 0x2ea   : > { %v529_v23 = vld [vmem:[#allocation3 + $0x8] sm:$0xff] (!%p696_p7) }
 0x2eb   : > { %521 = vst.msk [vmem:[#allocation4 + $0x8] sm:$0xff] %vm481_vm3, %v519_v21 }
 0x2ee   : > { %v528_v22 = vld [vmem:[#allocation3] sm:$0xff] }
 0x2ef   : > { %839 = vlog2.f32 %v528_v22 }
 0x2f0   : > { %841 = vlog2.f32 %v529_v23 }
 0x2f2   : > { %v537_v33 = vld [vmem:[#allocation4 + $0x8] sm:$0xff] }
 0x2f9   : > { %v840_v24 = vpop.eup %839 }
 0x2fa   : > { %v531_v26 = vmul.f32 0.6931472, %v840_v24  ;;  %v842_v27 = vpop.eup %841 }
 0x2fb   : > { %v533_v31 = vmul.f32 0.6931472, %v842_v27 }
 0x2fc   : > { %v534_v30 = vadd.f32 %v531_v26, %v526_v25 }
 0x2fd   : > { %v535_v37 = vadd.f32 %v533_v31, %v527_v29 }
 0x2fe   : > { %v538_v34 = vsub.f32 %v534_v30, %v536_v28  ;;  %v542_v35 = vmul.f32 0.1, %v534_v30  ;;  %v552_v36 = vmul.f32 0.0001, %v534_v30 }
 0x2ff   : > { %v539_v41 = vsub.f32 %v535_v37, %v537_v33  ;;  %v543_v42 = vmul.f32 0.1, %v535_v37  ;;  %v553_v43 = vmul.f32 0.0001, %v535_v37 }
 0x300   : > { %v540_v39 = vmul.f32 0.9, %v538_v34  ;;  %v554_v45 = vmul.f32 %v552_v36, %v534_v30 }
 0x301   : > { %v541_v47 = vmul.f32 0.9, %v539_v41  ;;  %v555_v51 = vmul.f32 %v553_v43, %v535_v37 }
 0x302   : > { %v544_v44 = vadd.f32 %v542_v35, %v540_v39 }
 0x303   : > { %v545_v50 = vadd.f32 %v543_v42, %v541_v47 }
 0x304   : > { %v550_v49 = vsub.f32 %v544_v44, %v548_v40 }
 0x305   : > { %v551_v54 = vsub.f32 %v545_v50, %v549_v48 }
 0x306   : > { %v556_v53 = vadd.f32 %v554_v45, %v550_v49 }
 0x307   : > { %v557_v56 = vadd.f32 %v555_v51, %v551_v54 }
 0x308   : > { %v562_v55 = vsel %vm560_vm6, %v556_v53, 0.0 }
 0x309   : > { %564 = vst.msk [vmem:[%s1040_s4] sm:$0xff] %vm481_vm3, %v562_v55  ;;  %v563_v57 = vsel %vm561_vm7, %v557_v56, 0.0 }
 0x30a   : > { %565 = vst.msk [vmem:[%s1040_s4 + $0x8] sm:$0xff] %vm481_vm3, %v563_v57 }
 0x30b PF: > { %s14_s17 = sadd.s32 1, %s865_s17   ;;  %s1043_s15 = smov %s861_s16 }
 0x30c   : > { %p11_p8 = scmp.ge.s32.totalorder %s14_s17, 4   ;;  %s1044_s16 = smov %s1046_s18 }
 0x30e   :  { %13 = sbr.rel (!%p11_p8) target bundleno = 2 (0x2), region = 83 }

</bundles_post_ra>
